<compile_context>
chip_gen: v6e
topology: v6e:2x2x1
jax: 0.10.0
libtpu: 0.0.40
codegen_flags: <defaults>
</compile_context>

<pallas_src>
import jax
import jax.numpy as jnp
from jax.experimental import pallas as pl
from jax.experimental.pallas import tpu as pltpu


def _round_up(x, m):
    return ((x + m - 1) // m) * m


def _choose_batch_tile(batch, seq, dim, itemsize, target_bytes=2 * 1024 * 1024):
    """Pick a batch tile so one (TB, S, D) VMEM buffer is ~target_bytes."""
    # VMEM footprint of one buffer after (8, 128) layout padding of (S, D).
    row_bytes = _round_up(seq, 8) * _round_up(dim, 128) * itemsize
    tb = max(1, target_bytes // row_bytes)
    tb = max(8, (tb // 8) * 8)            # sublane-aligned
    tb = min(tb, 1024)
    tb = min(tb, _round_up(batch, 8))     # never bigger than the padded batch
    return int(tb)


def _attn_pool_classify_kernel(x_ref, wa_ref, ba_ref, wc_ref, bc_ref, o_ref):
    # x_ref : (TB, S, D)  encoded features (input dtype; bf16 stays bf16)
    # wa_ref: (1, 1, D)   attention_weights.weight   (f32)
    # ba_ref: (1, 1)      attention_weights.bias     (f32)
    # wc_ref: (1, 1, D)   classifier.weight          (f32)
    # bc_ref: (1, 1)      classifier.bias            (f32)
    # o_ref : (TB, 1)     sigmoid(logits)            (f32)
    x = x_ref[...]
    wa = wa_ref[...]          # (1, 1, D), already f32 from the wrapper
    wc = wc_ref[...]
    ba = ba_ref[0, 0]
    bc = bc_ref[0, 0]

    # Attention scores = Linear(D, 1)(tanh(x)); keep softmax state as (TB, S).
    # tanh runs in the input dtype on the EUP; the D-contraction accumulates
    # in f32 on the VPU/XLU (an N=1 MXU matmul would be wasted here).
    xt = jnp.tanh(x)
    scores = jnp.sum(xt.astype(jnp.float32) * wa, axis=-1) + ba       # (TB, S)

    # Numerically stable softmax over the sequence axis (PyTorch dim=1).
    m = jnp.max(scores, axis=-1, keepdims=True)                       # (TB, 1)
    e = jnp.exp(scores - m)                                           # (TB, S)
    denom = jnp.sum(e, axis=-1, keepdims=True)                        # (TB, 1)

    # Fused attention pooling + classifier:
    #   logit[b] = sum_s softmax(scores)[b, s] * (sum_d x[b, s, d] * wc[d]) + bc
    # Identical to classifier(sum_s attn * x) but avoids a (TB, D) pooled
    # intermediate and any (TB, S, 1) broadcast temporaries.
    c = jnp.sum(x.astype(jnp.float32) * wc, axis=-1)                  # (TB, S)
    num = jnp.sum(e * c, axis=-1, keepdims=True)                      # (TB, 1)
    # Only TB reciprocals remain after the fusion; exact reciprocal keeps
    # tight parity with the reference at negligible cost (kernel is DMA-bound).
    logit = num * pl.reciprocal(denom, approx=False) + bc             # (TB, 1)
    o_ref[...] = jax.nn.sigmoid(logit).astype(o_ref.dtype)


def model_trans_head(encoded_feature, wa, ba, wc, bc):
    """encoded_feature: (B, S, D). Returns sigmoid(logits) of shape (B,), f32."""
    B, S, D = encoded_feature.shape
    itemsize = jnp.dtype(encoded_feature.dtype).itemsize
    tb = _choose_batch_tile(B, S, D, itemsize)
    b_pad = _round_up(B, tb)

    x = encoded_feature
    if b_pad != B:
        # Zero padding is harmless: padded rows produce sigmoid(bc), sliced
        # off below (softmax over a constant row is uniform -> no NaNs).
        x = jnp.pad(x, ((0, b_pad - B), (0, 0), (0, 0)))

    wa3 = wa.reshape(1, 1, D).astype(jnp.float32)
    wc3 = wc.reshape(1, 1, D).astype(jnp.float32)
    ba2 = ba.reshape(1, 1).astype(jnp.float32)
    bc2 = bc.reshape(1, 1).astype(jnp.float32)

    out = pl.pallas_call(
        _attn_pool_classify_kernel,
        out_shape=jax.ShapeDtypeStruct((b_pad, 1), jnp.float32),
        grid=(b_pad // tb,),
        in_specs=[
            pl.BlockSpec((tb, S, D), lambda i: (i, 0, 0)),
            pl.BlockSpec((1, 1, D), lambda i: (0, 0, 0)),
            pl.BlockSpec((1, 1), lambda i: (0, 0)),
            pl.BlockSpec((1, 1, D), lambda i: (0, 0, 0)),
            pl.BlockSpec((1, 1), lambda i: (0, 0)),
        ],
        out_specs=pl.BlockSpec((tb, 1), lambda i: (i, 0)),
        compiler_params=pltpu.CompilerParams(
            dimension_semantics=("parallel",),
        ),
    )(x, wa3, ba2, wc3, bc2)
    return out[:B, 0]  # .squeeze(1), drop padded rows


def _reference(encoded_feature, wa, ba, wc, bc):
    # Elementwise reference (no matmuls) so it is exact f32 regardless of the
    # backend's default matmul precision.
    x = encoded_feature.astype(jnp.float32)
    scores = jnp.sum(jnp.tanh(x) * wa.reshape(1, 1, -1), axis=-1) + ba[0]  # (B, S)
    attn = jax.nn.softmax(scores, axis=1)                                  # (B, S)
    pooled = jnp.sum(attn[:, :, None] * x, axis=1)                         # (B, D)
    logit = jnp.sum(pooled * wc.reshape(1, -1), axis=-1) + bc[0]           # (B,)
    return jax.nn.sigmoid(logit)


if __name__ == "__main__":
    # Small shapes consistent with the module: batch=2, seq=8, intermediate_dims=128.
    B, S, D = 2, 8, 128
    key = jax.random.PRNGKey(0)
    k_x, k_wa, k_ba, k_wc, k_bc = jax.random.split(key, 5)

    # Stand-in for encoder(text_embedding(text)) output.
    encoded_feature = jax.random.normal(k_x, (B, S, D), dtype=jnp.float32)

    # Deterministic parameter init (nn.Linear(D, 1) weights/biases).
    wa = jax.random.normal(k_wa, (1, D), dtype=jnp.float32) * 0.1
    ba = jax.random.normal(k_ba, (1,), dtype=jnp.float32) * 0.1
    wc = jax.random.normal(k_wc, (1, D), dtype=jnp.float32) * 0.1
    bc = jax.random.normal(k_bc, (1,), dtype=jnp.float32) * 0.1

    logits = model_trans_head(encoded_feature, wa, ba, wc, bc)
    logits = jax.block_until_ready(logits)

    ref = _reference(encoded_feature, wa, ba, wc, bc)
    assert logits.shape == (B,)
    assert jnp.allclose(logits, ref, atol=1e-5, rtol=1e-5), (logits, ref)

    print("KERNEL_OK")
</pallas_src>

<mosaic_0001>
module attributes {stable_mosaic.version = 11 : i64} {
  func.func @_attn_pool_classify_kernel(%arg0: i32, %arg1: memref<8x8x128xf32, #tpu.memory_space<vmem>>, %arg2: memref<1x1x128xf32, #tpu.memory_space<vmem>>, %arg3: memref<1x1xf32, #tpu.memory_space<vmem>>, %arg4: memref<1x1x128xf32, #tpu.memory_space<vmem>>, %arg5: memref<1x1xf32, #tpu.memory_space<vmem>>, %arg6: memref<8x1xf32, #tpu.memory_space<vmem>>) attributes {dimension_semantics = [#tpu.dimension_semantics<parallel>], iteration_bounds = array<i64: 1>, scalar_prefetch = 0 : i64, scratch_operands = 0 : i64, tpu.core_type = #tpu.core_type<tc>, window_params = [{transform_indices = @transform_0, window_bounds = array<i64: 8, 8, 128>}, {pipeline_mode = #tpu.pipeline_mode<synchronous>, transform_indices = @transform_1, window_bounds = array<i64: 1, 1, 128>}, {pipeline_mode = #tpu.pipeline_mode<synchronous>, transform_indices = @transform_2, window_bounds = array<i64: 1, 1>}, {pipeline_mode = #tpu.pipeline_mode<synchronous>, transform_indices = @transform_3, window_bounds = array<i64: 1, 1, 128>}, {pipeline_mode = #tpu.pipeline_mode<synchronous>, transform_indices = @transform_4, window_bounds = array<i64: 1, 1>}, {transform_indices = @transform_5, window_bounds = array<i64: 8, 1>}]} {
    %c0 = arith.constant 0 : index
    %c0_0 = arith.constant 0 : index
    %c0_1 = arith.constant 0 : index
    %0 = vector.load %arg1[%c0, %c0_0, %c0_1] : memref<8x8x128xf32, #tpu.memory_space<vmem>>, vector<8x8x128xf32>
    %c0_2 = arith.constant 0 : index
    %c0_3 = arith.constant 0 : index
    %c0_4 = arith.constant 0 : index
    %1 = vector.load %arg2[%c0_2, %c0_3, %c0_4] : memref<1x1x128xf32, #tpu.memory_space<vmem>>, vector<1x1x128xf32>
    %c0_5 = arith.constant 0 : index
    %c0_6 = arith.constant 0 : index
    %c0_7 = arith.constant 0 : index
    %2 = vector.load %arg4[%c0_5, %c0_6, %c0_7] : memref<1x1x128xf32, #tpu.memory_space<vmem>>, vector<1x1x128xf32>
    %c0_8 = arith.constant 0 : index
    %c0_9 = arith.constant 0 : index
    %3 = vector.load %arg3[%c0_8, %c0_9] : memref<1x1xf32, #tpu.memory_space<vmem>>, vector<1x1xf32>
    %4 = vector.extract %3[0, 0] : f32 from vector<1x1xf32>
    %c0_10 = arith.constant 0 : index
    %c0_11 = arith.constant 0 : index
    %5 = vector.load %arg5[%c0_10, %c0_11] : memref<1x1xf32, #tpu.memory_space<vmem>>, vector<1x1xf32>
    %6 = vector.extract %5[0, 0] : f32 from vector<1x1xf32>
    %7 = math.tanh %0 : vector<8x8x128xf32>
    %8 = vector.broadcast %1 : vector<1x1x128xf32> to vector<8x8x128xf32>
    %9 = arith.mulf %7, %8 : vector<8x8x128xf32>
    %cst = arith.constant dense<0.000000e+00> : vector<8x8xf32>
    %10 = vector.multi_reduction <add>, %9, %cst [2] : vector<8x8x128xf32> to vector<8x8xf32>
    %11 = vector.broadcast %4 : f32 to vector<8x8xf32>
    %12 = arith.addf %10, %11 : vector<8x8xf32>
    %cst_12 = arith.constant dense<0xFF800000> : vector<8xf32>
    %13 = vector.multi_reduction <maximumf>, %12, %cst_12 [1] : vector<8x8xf32> to vector<8xf32>
    %14 = vector.shape_cast %13 : vector<8xf32> to vector<8x1xf32>
    %15 = vector.broadcast %14 : vector<8x1xf32> to vector<8x8xf32>
    %16 = arith.subf %12, %15 : vector<8x8xf32>
    %17 = math.exp %16 : vector<8x8xf32>
    %cst_13 = arith.constant dense<0.000000e+00> : vector<8xf32>
    %18 = vector.multi_reduction <add>, %17, %cst_13 [1] : vector<8x8xf32> to vector<8xf32>
    %19 = vector.shape_cast %18 : vector<8xf32> to vector<8x1xf32>
    %20 = vector.broadcast %2 : vector<1x1x128xf32> to vector<8x8x128xf32>
    %21 = arith.mulf %0, %20 : vector<8x8x128xf32>
    %cst_14 = arith.constant dense<0.000000e+00> : vector<8x8xf32>
    %22 = vector.multi_reduction <add>, %21, %cst_14 [2] : vector<8x8x128xf32> to vector<8x8xf32>
    %23 = arith.mulf %17, %22 : vector<8x8xf32>
    %cst_15 = arith.constant dense<0.000000e+00> : vector<8xf32>
    %24 = vector.multi_reduction <add>, %23, %cst_15 [1] : vector<8x8xf32> to vector<8xf32>
    %25 = vector.shape_cast %24 : vector<8xf32> to vector<8x1xf32>
    %26 = tpu.reciprocal %19 : vector<8x1xf32> -> vector<8x1xf32>
    %27 = arith.mulf %25, %26 : vector<8x1xf32>
    %28 = vector.broadcast %6 : f32 to vector<8x1xf32>
    %29 = arith.addf %27, %28 : vector<8x1xf32>
    %30 = arith.negf %29 : vector<8x1xf32>
    %31 = math.exp %30 : vector<8x1xf32>
    %cst_16 = arith.constant 1.000000e+00 : f32
    %32 = vector.broadcast %cst_16 : f32 to vector<8x1xf32>
    %33 = arith.addf %32, %31 : vector<8x1xf32>
    %34 = arith.divf %32, %33 : vector<8x1xf32>
    %c0_17 = arith.constant 0 : index
    %c0_18 = arith.constant 0 : index
    %35 = vector.load %arg6[%c0_17, %c0_18] : memref<8x1xf32, #tpu.memory_space<vmem>>, vector<8x1xf32>
    tpu.vector_store %arg6[%c0_17, %c0_18], %34 {strides = array<i32>} : memref<8x1xf32, #tpu.memory_space<vmem>>, vector<8x1xf32>,
    return
  }
  func.func @transform_0(%arg0: i32) -> (i32, i32, i32) {
    %c0_i32 = arith.constant 0 : i32
    %c0_i32_0 = arith.constant 0 : i32
    %c0_i32_1 = arith.constant 0 : i32
    return %arg0, %c0_i32, %c0_i32_0 : i32, i32, i32
  }
  func.func @transform_1(%arg0: i32) -> (i32, i32, i32) {
    %c0_i32 = arith.constant 0 : i32
    %c0_i32_0 = arith.constant 0 : i32
    %c0_i32_1 = arith.constant 0 : i32
    %c0_i32_2 = arith.constant 0 : i32
    return %c0_i32, %c0_i32_0, %c0_i32_1 : i32, i32, i32
  }
  func.func @transform_2(%arg0: i32) -> (i32, i32) {
    %c0_i32 = arith.constant 0 : i32
    %c0_i32_0 = arith.constant 0 : i32
    %c0_i32_1 = arith.constant 0 : i32
    return %c0_i32, %c0_i32_0 : i32, i32
  }
  func.func @transform_3(%arg0: i32) -> (i32, i32, i32) {
    %c0_i32 = arith.constant 0 : i32
    %c0_i32_0 = arith.constant 0 : i32
    %c0_i32_1 = arith.constant 0 : i32
    %c0_i32_2 = arith.constant 0 : i32
    return %c0_i32, %c0_i32_0, %c0_i32_1 : i32, i32, i32
  }
  func.func @transform_4(%arg0: i32) -> (i32, i32) {
    %c0_i32 = arith.constant 0 : i32
    %c0_i32_0 = arith.constant 0 : i32
    %c0_i32_1 = arith.constant 0 : i32
    return %c0_i32, %c0_i32_0 : i32, i32
  }
  func.func @transform_5(%arg0: i32) -> (i32, i32) {
    %c0_i32 = arith.constant 0 : i32
    %c0_i32_0 = arith.constant 0 : i32
    return %arg0, %c0_i32 : i32, i32
  }
}

</mosaic_0001>

<bundles_post_ra>
// kernel: tpu_custom_call.1
= control target key start
LH: loop header
LB: loop body
LE: loop exit
PB: predicated region body
PF: predicated region fallthrough
CT: control target
= control target key end

     0   :  { %s636_s0 = inlined_call_operand.hbm [shape: f32[8,8,128], index: 0, kind: input, shape index: {}]   ;;  %s637_s1 = inlined_call_operand.vmem [shape: f32[1,1,128], index: 1, kind: input, shape index: {}]   ;;  %s638_s2 = inlined_call_operand.<no memory space> [shape: f32[1,1], index: 2, kind: input, shape index: {}]   ;;  %s639_s3 = inlined_call_operand.vmem [shape: f32[1,1,128], index: 3, kind: input, shape index: {}]   ;;  %s640_s5 = inlined_call_operand.vmem [shape: f32[8,1], index: 5, kind: output, shape index: {}]   ;;  %s641_s4 = inlined_call_operand.<no memory space> [shape: f32[1,1], index: 4, kind: input, shape index: {}]  }
   0x1   :  { %v10_v0 = vstv %s638_s2  ;;  %v12_v1 = vstv %s641_s4 }
   0x2   :  { %11 = vst [vmem:[#allocation2] sm:$0x1] %v10_v0  ;;  %13 = vst [vmem:[#allocation3] sm:$0x1] %v12_v1 }
   0x3   :  { %14 = vsyncpa [#allocation5], 0  ;;  %s503_s22 = smov [#allocation4]  }
   0x4   :  { %s20_s23 = sshll.u32 %s503_s22, 4  ;;  %s21_s23 = int_to_ptr.vmem [resolvable:$true] %s20_s23 }
   0x5   :  { %s489_s24 = scalar_lea.vmem %s21_s23, 1024  ;;  %p494_p1 = scmp.lt.s32.totalorder %s21_s23, %s21_s23 }
   0x6   :  { %p490_p0 = scmp.ne.s32.totalorder %s21_s23, %s489_s24  ;;  %p495_p2 = scmp.lt.s32.totalorder %s489_s24, %s489_s24 }
   0x8   :  { %p496_p3 = por %p495_p2, %p494_p1 }
   0xa   :  { %p497_p4 = pnand %p496_p3, %p490_p0 }
   0xc   :  { %500 = shalt.err (!%p497_p4)
}
   0xd   :  { %s504_s25 = smov 128   ;;  %s505_s26 = smov 8  }
   0xe   :  { %26 = dma.hbm_to_vmem [thread:$0]  %s636_s0, 1024, %s21_s23, [#allocation5], %s504_s25, %s504_s25, %s505_s26  }
   0xf   :  { %501 = dma.done.wait [#allocation5], 1024  }
  0x10   :  { %502 = vsyncadd [#allocation5], 4294966272  ;;  %v40_v2 = vld [vmem:[#allocation4 + $0x10] sm:$0xff]  ;;  %v38_v3 = vld [vmem:[#allocation4] sm:$0xff]  ;;  %v107_v37 = vlaneseq  ;;  %vm141_vm0 = vcmask 1041409   ;;  %vm143_vm1 = vcmask 1042434  }
  0x11   :  { %443 = vtanh.f32 %v40_v2  ;;  %v41_v4 = vld [vmem:[#allocation4 + $0x18] sm:$0xff]  ;;  %v39_v5 = vld [vmem:[#allocation4 + $0x8] sm:$0xff]  ;;  %v42_v7 = vld [vmem:[#allocation4 + $0x20] sm:$0xff]  ;;  %vm145_vm2 = vcmask 1043459   ;;  %vm147_vm3 = vcmask 1044484   ;;  %vm149_vm4 = vcmask 1045509  }
  0x12   :  { %445 = vtanh.f32 %v38_v3  ;;  %v43_v6 = vld [vmem:[#allocation4 + $0x28] sm:$0xff]  ;;  %v48_v8 = vld [vmem:[#allocation2] sm:$0x1]  ;;  %v44_v10 = vld [vmem:[#allocation4 + $0x30] sm:$0xff]  ;;  %v108_v38 = vand.u32 127, %v107_v37  ;;  %v552_v39 = vshrl.u32 %v107_v37, 7 }
  0x13   :  { %447 = vtanh.f32 %v41_v4  ;;  %433 = vpush %v48_v8  ;;  %v45_v9 = vld [vmem:[#allocation4 + $0x38] sm:$0xff]  ;;  %vm151_vm5 = vcmask 1046534   ;;  %vm153_vm6 = vcmask 1047559   ;;  %vm156_vm7 = vcmask 64512  }
  0x14   :  { %449 = vtanh.f32 %v39_v5  ;;  %v430_v11 = vld [vmem:[%s637_s1] ss:$0 sm:$0xff]  ;;  %v555_v43 = vsub.s32 %v108_v38, %v552_v39  ;;  %vm423_vm8 = vcmask 7168  }
  0x15   :  { %451 = vtanh.f32 %v43_v6  ;;  %v431_v28 = vld [vmem:[%s639_s3] ss:$0 sm:$0xff] }
  0x16   :  { %453 = vtanh.f32 %v42_v7  ;;  %v306_v29 = vmul.f32 %v431_v28, %v38_v3  ;;  %v307_v30 = vmul.f32 %v431_v28, %v39_v5  ;;  %v308_v31 = vmul.f32 %v431_v28, %v40_v2 }
  0x17   :  { %455 = vtanh.f32 %v45_v9  ;;  %v309_v32 = vmul.f32 %v431_v28, %v41_v4  ;;  %v310_v33 = vmul.f32 %v431_v28, %v42_v7  ;;  %v311_v34 = vmul.f32 %v431_v28, %v43_v6 }
  0x18   :  { %457 = vtanh.f32 %v44_v10  ;;  %v312_v35 = vmul.f32 %v431_v28, %v44_v10  ;;  %v313_v36 = vmul.f32 %v431_v28, %v45_v9  ;;  %v506_v10 = vmov 0  }
  0x19   :  { %442 = vset.pattern.permute.xlu0 %v506_v10  ;;  %441 = vset.pattern.permute.xlu1 %v506_v10 }
  0x1e   :  { %v444_v12 = vpop.eup %443 }
  0x1f   :  { %v446_v13 = vpop.eup %445  ;;  %v68_v14 = vmul.f32 %v444_v12, %v430_v11  ;;  %v167_v12 = vsub.s32 1, %v552_v39 }
  0x20   :  { %v448_v15 = vpop.eup %447  ;;  %v66_v16 = vmul.f32 %v446_v13, %v430_v11  ;;  %v171_v13 = vsub.s32 2, %v552_v39 }
  0x21   :  { %v450_v17 = vpop.eup %449  ;;  %78 = vadd.xlane.f32.xlu1 %v68_v14  ;;  %v69_v18 = vmul.f32 %v448_v15, %v430_v11  ;;  %v179_v14 = vsub.s32 4, %v552_v39  ;;  %v175_v15 = vsub.s32 3, %v552_v39 }
  0x22   :  { %v452_v19 = vpop.eup %451  ;;  %74 = vadd.xlane.f32.xlu0 %v66_v16  ;;  %v67_v20 = vmul.f32 %v450_v17, %v430_v11  ;;  %v187_v17 = vsub.s32 6, %v552_v39 }
  0x23   :  { %v454_v21 = vpop.eup %453  ;;  %v71_v22 = vmul.f32 %v452_v19, %v430_v11 }
  0x24   :  { %v456_v23 = vpop.eup %455  ;;  %v70_v24 = vmul.f32 %v454_v21, %v430_v11 }
  0x25   :  { %80 = vadd.xlane.f32.xlu1 %v69_v18  ;;  %v458_v25 = vpop.eup %457  ;;  %v73_v26 = vmul.f32 %v456_v23, %v430_v11 }
  0x26   :  { %76 = vadd.xlane.f32.xlu0 %v67_v20  ;;  %v72_v27 = vmul.f32 %v458_v25, %v430_v11  ;;  %v163_v11 = vsub.s32 0, %v552_v39 }
  0x29   :  { %84 = vadd.xlane.f32.xlu1 %v71_v22 }
  0x2a   :  { %82 = vadd.xlane.f32.xlu0 %v70_v24 }
  0x2d   :  { %88 = vadd.xlane.f32.xlu1 %v73_v26 }
  0x2e   :  { %86 = vadd.xlane.f32.xlu0 %v72_v27 }
  0x31   :  { %314 = vadd.xlane.f32.xlu1 %v306_v29 }
  0x35   :  { %318 = vadd.xlane.f32.xlu1 %v308_v31 }
  0x39   :  { %322 = vadd.xlane.f32.xlu1 %v310_v33 }
  0x3d   :  { %326 = vadd.xlane.f32.xlu1 %v312_v35 }
  0x44   :  { %s434_s29 = spop %433 }
  0x45   :  { %v90_v41 = vstv %s434_s29 }
  0xaa   :  { %v79_v40 = vpop.xlane.xlu1 %78 }
  0xab   :  { %v75_v42 = vpop.xlane.xlu0 %74  ;;  %v559_v46 = vadd.f32 %v90_v41, %v79_v40 }
  0xac   :  { %v557_v44 = vadd.f32 %v90_v41, %v75_v42 }
  0xad   :  { %v120_v54 = vrot.slane %v559_v46, %v555_v43 }
  0xae   :  { %v81_v45 = vpop.xlane.xlu1 %80  ;;  %v112_v50 = vrot.slane %v557_v44, %v555_v43 }
  0xaf   :  { %v561_v47 = vadd.f32 %v90_v41, %v81_v45  ;;  %v77_v48 = vpop.xlane.xlu0 %76 }
  0xb0   :  { %v92_v49 = vadd.f32 %v90_v41, %v77_v48 }
  0xb1   :  { %v124_v51 = vrot.slane %v561_v47, %v555_v43 }
  0xb2   :  { %v116_v52 = vrot.slane %v92_v49, %v555_v43  ;;  %v85_v53 = vpop.xlane.xlu1 %84 }
  0xb3   :  { %v570_v55 = vadd.f32 %v90_v41, %v85_v53  ;;  %v83_v56 = vpop.xlane.xlu0 %82 }
  0xb4   :  { %v142_v57 = vsel %vm141_vm0, %v116_v52, %v112_v50  ;;  %v95_v58 = vadd.f32 %v90_v41, %v83_v56 }
  0xb5   :  { %v144_v59 = vsel %vm143_vm1, %v120_v54, %v142_v57  ;;  %v132_v63 = vrot.slane %v570_v55, %v555_v43 }
  0xb6   :  { %v146_v60 = vsel %vm145_vm2, %v124_v51, %v144_v59  ;;  %v128_v61 = vrot.slane %v95_v58, %v555_v43  ;;  %v89_v62 = vpop.xlane.xlu1 %88 }
  0xb7   :  { %v578_v0 = vadd.f32 %v90_v41, %v89_v62  ;;  %v87_v1 = vpop.xlane.xlu0 %86 }
  0xb8   :  { %v148_v2 = vsel %vm147_vm3, %v128_v61, %v146_v60  ;;  %v97_v3 = vadd.f32 %v90_v41, %v87_v1  ;;  %v191_v41 = vsub.s32 7, %v552_v39 }
  0xb9   :  { %v140_v4 = vrot.slane %v578_v0, %v555_v43  ;;  %v150_v6 = vsel %vm149_vm4, %v132_v63, %v148_v2 }
  0xba   :  { %v136_v5 = vrot.slane %v97_v3, %v555_v43  ;;  %v315_v35 = vpop.xlane.xlu1 %314 }
  0xbc   :  { %v152_v7 = vsel %vm151_vm5, %v136_v5, %v150_v6  ;;  %v50_v5 = vld [vmem:[#allocation3] sm:$0x1] }
  0xbd   :  { %v154_v8 = vsel %vm153_vm6, %v140_v4, %v152_v7  ;;  %435 = vpush %v50_v5 }
  0xbe   :  { %v157_v9 = vsel %vm156_vm7, %v154_v8, -inf  ;;  %v319_v42 = vpop.xlane.xlu1 %318 }
  0xbf   :  { %158 = vmax.xlane.f32.xlu0 %v157_v9 }
  0xc3   :  { %316 = vadd.xlane.f32.xlu0 %v307_v30 }
  0xc7   :  { %320 = vadd.xlane.f32.xlu0 %v309_v32  ;;  %v183_v32 = vsub.s32 5, %v552_v39 }
  0xcb   :  { %324 = vadd.xlane.f32.xlu0 %v311_v34 }
  0xcf   :  { %328 = vadd.xlane.f32.xlu0 %v313_v36 }
  0xee   :  { %s436_s3 = spop %435 }
 0x148   :  { %v159_v16 = vpop.xlane.xlu0 %158 }
 0x149   :  { %v164_v18 = vrot.slane %v159_v16, %v163_v11  ;;  %v168_v19 = vrot.slane %v159_v16, %v167_v12  ;;  %v172_v20 = vrot.slane %v159_v16, %v171_v13  ;;  %v180_v21 = vrot.slane %v159_v16, %v179_v14 }
 0x14a   :  { %v176_v25 = vrot.slane %v159_v16, %v175_v15  ;;  %v188_v27 = vrot.slane %v159_v16, %v187_v17  ;;  %v184_v37 = vrot.slane %v159_v16, %v183_v32  ;;  %v192_v45 = vrot.slane %v159_v16, %v191_v41 }
 0x14b   :  { %v201_v22 = vsub.f32 %v557_v44, %v164_v18  ;;  %v202_v23 = vsub.f32 %v92_v49, %v168_v19  ;;  %v203_v24 = vsub.f32 %v559_v46, %v172_v20  ;;  %v205_v26 = vsub.f32 %v95_v58, %v180_v21  ;;  %v323_v49 = vpop.xlane.xlu1 %322 }
 0x14c   :  { %v204_v31 = vsub.f32 %v561_v47, %v176_v25  ;;  %v207_v34 = vsub.f32 %v97_v3, %v188_v27  ;;  %v206_v40 = vsub.f32 %v570_v55, %v184_v37  ;;  %v208_v50 = vsub.f32 %v578_v0, %v192_v45  ;;  %v317_v59 = vpop.xlane.xlu0 %316 }
 0x14d   :  { %v209_v28 = vmul.f32 1.442695, %v201_v22  ;;  %v211_v29 = vmul.f32 1.442695, %v202_v23  ;;  %v213_v30 = vmul.f32 1.442695, %v203_v24 }
 0x14e   :  { %v217_v33 = vmul.f32 1.442695, %v205_v26  ;;  %v215_v36 = vmul.f32 1.442695, %v204_v31  ;;  %v221_v38 = vmul.f32 1.442695, %v207_v34 }
 0x14f   :  { %459 = vpow2.f32 %v209_v28  ;;  %v219_v44 = vmul.f32 1.442695, %v206_v40  ;;  %v223_v53 = vmul.f32 1.442695, %v208_v50  ;;  %v327_v56 = vpop.xlane.xlu1 %326 }
 0x150   :  { %461 = vpow2.f32 %v211_v29  ;;  %v321_v62 = vpop.xlane.xlu0 %320 }
 0x151   :  { %463 = vpow2.f32 %v213_v30 }
 0x152   :  { %465 = vpow2.f32 %v217_v33 }
 0x153   :  { %467 = vpow2.f32 %v215_v36 }
 0x154   :  { %469 = vpow2.f32 %v221_v38  ;;  %v325_v0 = vpop.xlane.xlu0 %324 }
 0x155   :  { %471 = vpow2.f32 %v219_v44 }
 0x156   :  { %473 = vpow2.f32 %v223_v53 }
 0x158   :  { %v329_v3 = vpop.xlane.xlu0 %328 }
 0x15c   :  { %v460_v46 = vpop.eup %459 }
 0x15d   :  { %v462_v47 = vpop.eup %461  ;;  %234 = vperm.xlu1 %441, %v460_v46   ;;  %v330_v61 = vmul.f32 %v460_v46, %v315_v35 }
 0x15e   :  { %v464_v48 = vpop.eup %463  ;;  %237 = vperm.xlu0 %442, %v462_v47   ;;  %v331_v63 = vmul.f32 %v462_v47, %v317_v59 }
 0x15f   :  { %v332_v51 = vmul.f32 %v464_v48, %v319_v42  ;;  %v466_v52 = vpop.eup %465 }
 0x160   :  { %v468_v54 = vpop.eup %467  ;;  %v334_v39 = vmul.f32 %v466_v52, %v323_v49 }
 0x161   :  { %240 = vperm.xlu1 %441, %v464_v48   ;;  %v470_v55 = vpop.eup %469  ;;  %v333_v1 = vmul.f32 %v468_v54, %v321_v62 }
 0x162   :  { %353 = vperm.xlu0 %442, %v332_v51   ;;  %v336_v57 = vmul.f32 %v470_v55, %v327_v56  ;;  %v472_v58 = vpop.eup %471 }
 0x163   :  { %v474_v60 = vpop.eup %473  ;;  %v335_v2 = vmul.f32 %v472_v58, %v325_v0 }
 0x164   :  { %v337_v4 = vmul.f32 %v474_v60, %v329_v3 }
 0x165   :  { %243 = vperm.xlu1 %441, %v468_v54  }
 0x166   :  { %359 = vperm.xlu0 %442, %v334_v39  }
 0x169   :  { %246 = vperm.xlu1 %441, %v466_v52  }
 0x16a   :  { %365 = vperm.xlu0 %442, %v336_v57  }
 0x16d   :  { %249 = vperm.xlu1 %441, %v472_v58   ;;  %v415_v58 = vstv %s436_s3 }
 0x171   :  { %252 = vperm.xlu1 %441, %v470_v55  }
 0x175   :  { %255 = vperm.xlu1 %441, %v474_v60  }
 0x179   :  { %347 = vperm.xlu1 %441, %v330_v61  }
 0x17d   :  { %350 = vperm.xlu1 %441, %v331_v63  }
 0x181   :  { %356 = vperm.xlu1 %441, %v333_v1  }
 0x185   :  { %362 = vperm.xlu1 %441, %v335_v2  }
 0x189   :  { %368 = vperm.xlu1 %441, %v337_v4  }
 0x1d8   :  { %v235_v6 = vpop.permute.xlu1 %234 }
 0x1d9   :  { %v238_v10 = vpop.permute.xlu0 %237  ;;  %v260_v12 = vrot.slane %v235_v6, %v555_v43 }
 0x1da   :  { %v264_v13 = vrot.slane %v238_v10, %v555_v43 }
 0x1dc   :  { %v241_v7 = vpop.permute.xlu1 %240  ;;  %v289_v18 = vsel %vm141_vm0, %v264_v13, %v260_v12 }
 0x1dd   :  { %v268_v14 = vrot.slane %v241_v7, %v555_v43  ;;  %v354_v31 = vpop.permute.xlu0 %353 }
 0x1de   :  { %v381_v37 = vrot.slane %v354_v31, %v555_v43 }
 0x1df   :  { %v290_v20 = vsel %vm143_vm1, %v268_v14, %v289_v18 }
 0x1e0   :  { %v244_v8 = vpop.permute.xlu1 %243 }
 0x1e1   :  { %v272_v15 = vrot.slane %v244_v8, %v555_v43  ;;  %v360_v35 = vpop.permute.xlu0 %359 }
 0x1e2   :  { %v389_v44 = vrot.slane %v360_v35, %v555_v43 }
 0x1e3   :  { %v291_v22 = vsel %vm145_vm2, %v272_v15, %v290_v20 }
 0x1e4   :  { %v247_v9 = vpop.permute.xlu1 %246 }
 0x1e5   :  { %v276_v16 = vrot.slane %v247_v9, %v555_v43  ;;  %v366_v46 = vpop.permute.xlu0 %365 }
 0x1e6   :  { %v397_v50 = vrot.slane %v366_v46, %v555_v43 }
 0x1e7   :  { %v292_v23 = vsel %vm147_vm3, %v276_v16, %v291_v22 }
 0x1e8   :  { %v250_v11 = vpop.permute.xlu1 %249 }
 0x1e9   :  { %v280_v19 = vrot.slane %v250_v11, %v555_v43 }
 0x1eb   :  { %v293_v25 = vsel %vm149_vm4, %v280_v19, %v292_v23 }
 0x1ec   :  { %v253_v17 = vpop.permute.xlu1 %252 }
 0x1ed   :  { %v284_v21 = vrot.slane %v253_v17, %v555_v43 }
 0x1ef   :  { %v294_v27 = vsel %vm151_vm5, %v284_v21, %v293_v25 }
 0x1f0   :  { %v256_v24 = vpop.permute.xlu1 %255 }
 0x1f1   :  { %v288_v26 = vrot.slane %v256_v24, %v555_v43 }
 0x1f3   :  { %v295_v28 = vsel %vm153_vm6, %v288_v26, %v294_v27 }
 0x1f4   :  { %v348_v29 = vpop.permute.xlu1 %347  ;;  %v297_v30 = vsel %vm156_vm7, %v295_v28, 0.0 }
 0x1f5   :  { %298 = vadd.xlane.f32.xlu0 %v297_v30  ;;  %v373_v33 = vrot.slane %v348_v29, %v555_v43 }
 0x1f8   :  { %v351_v32 = vpop.permute.xlu1 %350 }
 0x1f9   :  { %v377_v34 = vrot.slane %v351_v32, %v555_v43 }
 0x1fb   :  { %v402_v36 = vsel %vm141_vm0, %v377_v34, %v373_v33 }
 0x1fc   :  { %v357_v38 = vpop.permute.xlu1 %356  ;;  %v403_v41 = vsel %vm143_vm1, %v381_v37, %v402_v36 }
 0x1fd   :  { %v385_v40 = vrot.slane %v357_v38, %v555_v43 }
 0x1ff   :  { %v404_v42 = vsel %vm145_vm2, %v385_v40, %v403_v41 }
 0x200   :  { %v363_v45 = vpop.permute.xlu1 %362  ;;  %v405_v48 = vsel %vm147_vm3, %v389_v44, %v404_v42 }
 0x201   :  { %v393_v47 = vrot.slane %v363_v45, %v555_v43 }
 0x203   :  { %v406_v49 = vsel %vm149_vm4, %v393_v47, %v405_v48 }
 0x204   :  { %v369_v51 = vpop.permute.xlu1 %368  ;;  %v407_v53 = vsel %vm151_vm5, %v397_v50, %v406_v49 }
 0x205   :  { %v401_v52 = vrot.slane %v369_v51, %v555_v43 }
 0x207   :  { %v408_v54 = vsel %vm153_vm6, %v401_v52, %v407_v53 }
 0x208   :  { %v410_v39 = vsel %vm156_vm7, %v408_v54, 0.0 }
 0x209   :  { %411 = vadd.xlane.f32.xlu1 %v410_v39 }
 0x27e   :  { %v299_v55 = vpop.xlane.xlu0 %298 }
 0x27f   :  { %475 = vrcp.f32 %v299_v55 }
 0x28c   :  { %v476_v56 = vpop.eup %475 }
 0x292   :  { %v412_v57 = vpop.xlane.xlu1 %411 }
 0x293   :  { %v414_v59 = vmul.f32 %v476_v56, %v412_v57 }
 0x295   :  { %v416_v60 = vadd.f32 %v415_v58, %v414_v59 }
 0x297   :  { %v432_v61 = vmul.f32 -1.442695, %v416_v60 }
 0x299   :  { %477 = vpow2.f32 %v432_v61 }
 0x2a6   :  { %v478_v62 = vpop.eup %477 }
 0x2a7   :  { %v420_v63 = vadd.f32 1.0, %v478_v62 }
 0x2a9   :  { %479 = vrcp.f32 %v420_v63 }
 0x2b6   :  { %v480_v43 = vpop.eup %479 }
 0x2b7   :  { %424 = vst.msk [vmem:[%s640_s5] sm:$0xff] %vm423_vm8, %v480_v43 }
 0x2b8   :  { %429 = vsyncpa [#allocation5], 1 }

</bundles_post_ra>
